<compile_context>
chip_gen: v7x
topology: tpu7x:2x2x1
jax: 0.10.0
libtpu: 0.0.40
codegen_flags: <defaults>
</compile_context>

<pallas_src>
import jax
import jax.numpy as jnp
from jax.experimental import pallas as pl
from jax.experimental.pallas import tpu as pltpu


def _round_up(x, m):
    return ((x + m - 1) // m) * m


def als_kernel(u_ref, v_ref, o_ref):
    # u_ref, v_ref: (D, TB) f32 tiles — embedding dim on sublanes, batch on lanes.
    u = u_ref[...]
    v = v_ref[...]

    # Per-example scalar reductions over the embedding dim (sublane axis).
    uu = jnp.sum(u * u, axis=0, keepdims=True)       # (1, TB)
    vv = jnp.sum(v * v, axis=0, keepdims=True)       # (1, TB)
    uv = jnp.sum(u * v, axis=0, keepdims=True)       # (1, TB)

    # nn.Embedding(max_norm=1, p=2) forward semantics: rows with norm > 1 are
    # scaled by 1 / (norm + 1e-7).  Scaling the scalar dot product is
    # algebraically identical to scaling the rows first.
    u_norm = jnp.sqrt(uu)
    v_norm = jnp.sqrt(vv)
    su = jnp.where(u_norm > 1.0, 1.0 / (u_norm + 1e-7), 1.0)
    sv = jnp.where(v_norm > 1.0, 1.0 / (v_norm + 1e-7), 1.0)

    x = uv * su * sv                                  # bounded, |x| ~<= 1
    o_ref[...] = 1.0 / (1.0 + jnp.exp(-x))            # exp -> EUP slot


def als_forward(users_w, items_w, u_idx, v_idx, *, tb=512):
    """ALS forward. users_w: (n_users, D), items_w: (n_items, D),
    u_idx / v_idx: (B,) int32.  Returns (B,) f32 probabilities."""
    B = u_idx.shape[0]
    D = users_w.shape[1]

    # Lane tile: multiple of 128, no larger than needed for this batch.
    tb = _round_up(min(tb, _round_up(B, 128)), 128)
    B_pad = _round_up(B, tb)

    # Pad indices (index 0 is always valid); padded lanes are sliced off below.
    pad = B_pad - B
    u_idx_p = jnp.pad(u_idx, (0, pad))
    v_idx_p = jnp.pad(v_idx, (0, pad))

    # Glue: gather + transpose so the batch axis lands on lanes.  (D, B_pad)
    u_emb = jnp.take(users_w, u_idx_p, axis=0).T
    v_emb = jnp.take(items_w, v_idx_p, axis=0).T

    out = pl.pallas_call(
        als_kernel,
        out_shape=jax.ShapeDtypeStruct((1, B_pad), jnp.float32),
        grid=(B_pad // tb,),
        in_specs=[
            pl.BlockSpec((D, tb), lambda i: (0, i)),
            pl.BlockSpec((D, tb), lambda i: (0, i)),
        ],
        out_specs=pl.BlockSpec((1, tb), lambda i: (0, i)),
        compiler_params=pltpu.CompilerParams(
            dimension_semantics=("parallel",)),
    )(u_emb, v_emb)
    return out[0, :B]


def als_reference(users_w, items_w, u_idx, v_idx):
    """Pure-JAX reference matching PyTorch forward semantics."""
    def renorm(e):
        n = jnp.linalg.norm(e, axis=1, keepdims=True)
        return jnp.where(n > 1.0, e / (n + 1e-7), e)
    u = renorm(jnp.take(users_w, u_idx, axis=0))
    v = renorm(jnp.take(items_w, v_idx, axis=0))
    return jax.nn.sigmoid(jnp.sum(u * v, axis=1))


if __name__ == "__main__":
    n_users, n_items, dim = 10, 12, 32
    batch = 8

    key = jax.random.PRNGKey(0)
    k_u, k_i, k_ui, k_vi = jax.random.split(key, 4)

    users_w = jax.random.normal(k_u, (n_users, dim), dtype=jnp.float32)
    items_w = jax.random.normal(k_i, (n_items, dim), dtype=jnp.float32)

    u_idx = jax.random.randint(k_ui, (batch,), 0, n_users, dtype=jnp.int32)
    v_idx = jax.random.randint(k_vi, (batch,), 0, n_items, dtype=jnp.int32)

    fwd = jax.jit(als_forward)

    # Small case (single padded tile).
    logits = fwd(users_w, items_w, u_idx, v_idx)
    jax.block_until_ready(logits)
    ref = als_reference(users_w, items_w, u_idx, v_idx)
    assert logits.shape == (batch,)
    assert jnp.allclose(logits, ref, atol=1e-5, rtol=1e-5), (logits, ref)

    # Larger, non-tile-multiple batch exercises multi-step grid + padding path.
    big = 1000
    k_bu, k_bv = jax.random.split(jax.random.PRNGKey(1), 2)
    bu = jax.random.randint(k_bu, (big,), 0, n_users, dtype=jnp.int32)
    bv = jax.random.randint(k_bv, (big,), 0, n_items, dtype=jnp.int32)
    big_logits = fwd(users_w, items_w, bu, bv)
    jax.block_until_ready(big_logits)
    big_ref = als_reference(users_w, items_w, bu, bv)
    assert big_logits.shape == (big,)
    assert jnp.allclose(big_logits, big_ref, atol=1e-5, rtol=1e-5)

    print("KERNEL_OK")
</pallas_src>

<mosaic_0001>
module attributes {stable_mosaic.version = 11 : i64} {
  func.func @als_kernel(%arg0: i32, %arg1: memref<32x128xf32, #tpu.memory_space<vmem>>, %arg2: memref<32x128xf32, #tpu.memory_space<vmem>>, %arg3: memref<1x128xf32, #tpu.memory_space<vmem>>) attributes {dimension_semantics = [#tpu.dimension_semantics<parallel>], iteration_bounds = array<i64: 1>, scalar_prefetch = 0 : i64, scratch_operands = 0 : i64, tpu.core_type = #tpu.core_type<tc>, window_params = [{transform_indices = @transform_0, window_bounds = array<i64: 32, 128>}, {transform_indices = @transform_1, window_bounds = array<i64: 32, 128>}, {transform_indices = @transform_2, window_bounds = array<i64: 1, 128>}]} {
    %c0 = arith.constant 0 : index
    %c0_0 = arith.constant 0 : index
    %0 = vector.load %arg1[%c0, %c0_0] : memref<32x128xf32, #tpu.memory_space<vmem>>, vector<32x128xf32>
    %c0_1 = arith.constant 0 : index
    %c0_2 = arith.constant 0 : index
    %1 = vector.load %arg2[%c0_1, %c0_2] : memref<32x128xf32, #tpu.memory_space<vmem>>, vector<32x128xf32>
    %2 = arith.mulf %0, %0 : vector<32x128xf32>
    %cst = arith.constant dense<0.000000e+00> : vector<128xf32>
    %3 = vector.multi_reduction <add>, %2, %cst [0] : vector<32x128xf32> to vector<128xf32>
    %4 = vector.shape_cast %3 : vector<128xf32> to vector<1x128xf32>
    %5 = arith.mulf %1, %1 : vector<32x128xf32>
    %cst_3 = arith.constant dense<0.000000e+00> : vector<128xf32>
    %6 = vector.multi_reduction <add>, %5, %cst_3 [0] : vector<32x128xf32> to vector<128xf32>
    %7 = vector.shape_cast %6 : vector<128xf32> to vector<1x128xf32>
    %8 = arith.mulf %0, %1 : vector<32x128xf32>
    %cst_4 = arith.constant dense<0.000000e+00> : vector<128xf32>
    %9 = vector.multi_reduction <add>, %8, %cst_4 [0] : vector<32x128xf32> to vector<128xf32>
    %10 = vector.shape_cast %9 : vector<128xf32> to vector<1x128xf32>
    %11 = math.sqrt %4 : vector<1x128xf32>
    %12 = math.sqrt %7 : vector<1x128xf32>
    %cst_5 = arith.constant 1.000000e+00 : f32
    %13 = vector.broadcast %cst_5 : f32 to vector<1x128xf32>
    %14 = arith.cmpf ogt, %11, %13 : vector<1x128xf32>
    %cst_6 = arith.constant 1.000000e-07 : f32
    %15 = vector.broadcast %cst_6 : f32 to vector<1x128xf32>
    %16 = arith.addf %11, %15 : vector<1x128xf32>
    %cst_7 = arith.constant 1.000000e+00 : f32
    %17 = vector.broadcast %cst_7 : f32 to vector<1x128xf32>
    %18 = arith.divf %17, %16 : vector<1x128xf32>
    %cst_8 = arith.constant 1.000000e+00 : f32
    %19 = vector.broadcast %cst_8 : f32 to vector<1x128xf32>
    %20 = arith.select %14, %18, %19 : vector<1x128xi1>, vector<1x128xf32>
    %cst_9 = arith.constant 1.000000e+00 : f32
    %21 = vector.broadcast %cst_9 : f32 to vector<1x128xf32>
    %22 = arith.cmpf ogt, %12, %21 : vector<1x128xf32>
    %cst_10 = arith.constant 1.000000e-07 : f32
    %23 = vector.broadcast %cst_10 : f32 to vector<1x128xf32>
    %24 = arith.addf %12, %23 : vector<1x128xf32>
    %cst_11 = arith.constant 1.000000e+00 : f32
    %25 = vector.broadcast %cst_11 : f32 to vector<1x128xf32>
    %26 = arith.divf %25, %24 : vector<1x128xf32>
    %cst_12 = arith.constant 1.000000e+00 : f32
    %27 = vector.broadcast %cst_12 : f32 to vector<1x128xf32>
    %28 = arith.select %22, %26, %27 : vector<1x128xi1>, vector<1x128xf32>
    %29 = arith.mulf %10, %20 : vector<1x128xf32>
    %30 = arith.mulf %29, %28 : vector<1x128xf32>
    %cst_13 = arith.constant 0.000000e+00 : f32
    %31 = vector.broadcast %cst_13 : f32 to vector<1x128xf32>
    %32 = arith.subf %31, %30 : vector<1x128xf32>
    %33 = math.exp %32 : vector<1x128xf32>
    %cst_14 = arith.constant 1.000000e+00 : f32
    %34 = vector.broadcast %cst_14 : f32 to vector<1x128xf32>
    %35 = arith.addf %34, %33 : vector<1x128xf32>
    %cst_15 = arith.constant 1.000000e+00 : f32
    %36 = vector.broadcast %cst_15 : f32 to vector<1x128xf32>
    %37 = arith.divf %36, %35 : vector<1x128xf32>
    %c0_16 = arith.constant 0 : index
    %c0_17 = arith.constant 0 : index
    %38 = vector.load %arg3[%c0_16, %c0_17] : memref<1x128xf32, #tpu.memory_space<vmem>>, vector<1x128xf32>
    tpu.vector_store %arg3[%c0_16, %c0_17], %37 {strides = array<i32>} : memref<1x128xf32, #tpu.memory_space<vmem>>, vector<1x128xf32>,
    return
  }
  func.func @transform_0(%arg0: i32) -> (i32, i32) {
    %c0_i32 = arith.constant 0 : i32
    %c0_i32_0 = arith.constant 0 : i32
    return %c0_i32, %arg0 : i32, i32
  }
  func.func @transform_1(%arg0: i32) -> (i32, i32) {
    %c0_i32 = arith.constant 0 : i32
    %c0_i32_0 = arith.constant 0 : i32
    return %c0_i32, %arg0 : i32, i32
  }
  func.func @transform_2(%arg0: i32) -> (i32, i32) {
    %c0_i32 = arith.constant 0 : i32
    %c0_i32_0 = arith.constant 0 : i32
    return %c0_i32, %arg0 : i32, i32
  }
}

</mosaic_0001>

<bundles_post_ra>
// kernel: als_forward.1
= control target key start
LH: loop header
LB: loop body
LE: loop exit
PB: predicated region body
PF: predicated region fallthrough
CT: control target
= control target key end

     0   :  { %s149_s0 = inlined_call_operand.vmem [shape: f32[32,128], index: 0, kind: input, shape index: {}]   ;;  %s150_s1 = inlined_call_operand.vmem [shape: f32[32,128], index: 1, kind: input, shape index: {}]   ;;  %s151_s2 = inlined_call_operand.vmem [shape: f32[1,128], index: 2, kind: output, shape index: {}]  }
   0x1   :  { %v11_v0 = vld [vmem:[%s149_s0] sm:$0xff]  ;;  %v12_v1 = vld [vmem:[%s149_s0 + $0x8] sm:$0xff]  ;;  %v13_v2 = vld [vmem:[%s149_s0 + $0x10] sm:$0xff] }
   0x2   :  { %v14_v3 = vld [vmem:[%s149_s0 + $0x18] sm:$0xff]  ;;  %v15_v4 = vld [vmem:[%s150_s1] sm:$0xff]  ;;  %v16_v5 = vld [vmem:[%s150_s1 + $0x8] sm:$0xff]  ;;  %v19_v6 = vmul.f32 %v11_v0, %v11_v0  ;;  %v20_v7 = vmul.f32 %v12_v1, %v12_v1  ;;  %v21_v8 = vmul.f32 %v13_v2, %v13_v2 }
   0x3   :  { %v17_v9 = vld [vmem:[%s150_s1 + $0x10] sm:$0xff]  ;;  %v18_v10 = vld [vmem:[%s150_s1 + $0x18] sm:$0xff]  ;;  %v32_v11 = vmul.f32 %v15_v4, %v15_v4  ;;  %v33_v12 = vmul.f32 %v16_v5, %v16_v5  ;;  %v22_v13 = vmul.f32 %v14_v3, %v14_v3  ;;  %v45_v24 = vmul.f32 %v15_v4, %v11_v0 }
   0x4   :  { %v23_v14 = vadd.f32 %v20_v7, %v19_v6  ;;  %v34_v15 = vmul.f32 %v17_v9, %v17_v9  ;;  %v35_v16 = vmul.f32 %v18_v10, %v18_v10  ;;  %v46_v25 = vmul.f32 %v16_v5, %v12_v1 }
   0x5   :  { %v36_v17 = vadd.f32 %v33_v12, %v32_v11  ;;  %v47_v30 = vmul.f32 %v17_v9, %v13_v2  ;;  %v48_v36 = vmul.f32 %v18_v10, %v14_v3 }
   0x6   :  { %v24_v18 = vadd.f32 %v23_v14, %v21_v8  ;;  %v49_v31 = vadd.f32 %v46_v25, %v45_v24 }
   0x7   :  { %v37_v19 = vadd.f32 %v36_v17, %v34_v15 }
   0x8   :  { %v25_v20 = vadd.f32 %v24_v18, %v22_v13  ;;  %v50_v37 = vadd.f32 %v49_v31, %v47_v30 }
   0x9   :  { %v38_v21 = vadd.f32 %v37_v19, %v35_v16 }
   0xa   :  { %v26_v22 = vrot.slane %v25_v20, 4  ;;  %v51_v40 = vadd.f32 %v50_v37, %v48_v36 }
   0xb   :  { %v39_v23 = vrot.slane %v38_v21, 4 }
   0xc   :  { %v27_v26 = vadd.f32 %v26_v22, %v25_v20  ;;  %v52_v41 = vrot.slane %v51_v40, 4 }
   0xd   :  { %v40_v27 = vadd.f32 %v39_v23, %v38_v21 }
   0xe   :  { %v28_v28 = vrot.slane %v27_v26, 2  ;;  %v53_v42 = vadd.f32 %v52_v41, %v51_v40 }
   0xf   :  { %v41_v29 = vrot.slane %v40_v27, 2 }
  0x10   :  { %v29_v32 = vadd.f32 %v28_v28, %v27_v26  ;;  %v54_v49 = vrot.slane %v53_v42, 2 }
  0x11   :  { %v42_v33 = vadd.f32 %v41_v29, %v40_v27 }
  0x12   :  { %v30_v34 = vrot.slane %v29_v32, 1  ;;  %v55_v56 = vadd.f32 %v54_v49, %v53_v42 }
  0x13   :  { %v43_v35 = vrot.slane %v42_v33, 1 }
  0x14   :  { %v31_v38 = vadd.f32 %v30_v34, %v29_v32  ;;  %v56_v57 = vrot.slane %v55_v56, 1 }
  0x15   :  { %v44_v39 = vadd.f32 %v43_v35, %v42_v33 }
  0x16   :  { %95 = vrsqrt.f32 %v31_v38  ;;  %vm60_vm0 = vcmp.eq.f32.partialorder %v31_v38, inf  ;;  %v63_v44 = vand.u32 2147483648, %v31_v38  ;;  %vm62_vm1 = vcmp.eq.f32.partialorder %v31_v38, 0.0 }
  0x17   :  { %97 = vrsqrt.f32 %v44_v39  ;;  %vm67_vm2 = vcmp.eq.f32.partialorder %v44_v39, inf  ;;  %v70_v47 = vand.u32 2147483648, %v44_v39  ;;  %vm69_vm3 = vcmp.eq.f32.partialorder %v44_v39, 0.0 }
  0x18   :  { %v57_v58 = vadd.f32 %v56_v57, %v55_v56 }
  0x20   :  { %v96_v43 = vpop.eup %95 }
  0x21   :  { %v98_v45 = vpop.eup %97  ;;  %v59_v46 = vmul.f32 %v96_v43, %v31_v38 }
  0x22   :  { %v66_v48 = vmul.f32 %v98_v45, %v44_v39 }
  0x23   :  { %v61_v50 = vsel %vm60_vm0, %v31_v38, %v59_v46 }
  0x24   :  { %v64_v51 = vsel %vm62_vm1, %v63_v44, %v61_v50  ;;  %v68_v52 = vsel %vm67_vm2, %v44_v39, %v66_v48 }
  0x25   :  { %v71_v53 = vsel %vm69_vm3, %v70_v47, %v68_v52  ;;  %v73_v54 = vadd.f32 1e-07, %v64_v51  ;;  %vm72_vm4 = vcmp.gt.f32.partialorder %v64_v51, 1.0 }
  0x26   :  { %v78_v55 = vadd.f32 1e-07, %v71_v53  ;;  %vm77_vm5 = vcmp.gt.f32.partialorder %v71_v53, 1.0 }
  0x27   :  { %99 = vrcp.f32 %v73_v54 }
  0x28   :  { %101 = vrcp.f32 %v78_v55 }
  0x31   :  { %v100_v59 = vpop.eup %99 }
  0x32   :  { %v102_v60 = vpop.eup %101  ;;  %v76_v61 = vsel %vm72_vm4, %v100_v59, 1.0 }
  0x33   :  { %v81_v62 = vsel %vm77_vm5, %v102_v60, 1.0  ;;  %v82_v63 = vmul.f32 %v76_v61, %v57_v58 }
  0x35   :  { %v83_v0 = vmul.f32 %v82_v63, %v81_v62 }
  0x37   :  { %v84_v1 = vsub.f32 0.0, %v83_v0 }
  0x39   :  { %v85_v2 = vmul.f32 1.442695, %v84_v1 }
  0x3b   :  { %103 = vpow2.f32 %v85_v2 }
  0x45   :  { %v104_v3 = vpop.eup %103 }
  0x46   :  { %v87_v4 = vadd.f32 1.0, %v104_v3 }
  0x48   :  { %105 = vrcp.f32 %v87_v4 }
  0x52   :  { %v106_v5 = vpop.eup %105 }
  0x53   :  { %90 = vst [vmem:[%s151_s2] sm:$0x1] %v106_v5 }

</bundles_post_ra>
